<compile_context>
chip_gen: v6e
topology: v6e:2x2x1
jax: 0.10.0
libtpu: 0.0.40
codegen_flags: <defaults>
</compile_context>

<pallas_src>
import functools

import jax
import jax.numpy as jnp
from jax.experimental import pallas as pl
from jax.experimental.pallas import tpu as pltpu


HIDDEN = 64          # logical hidden size (matches nn.Linear(…, 64))
HIDDEN_PAD = 128     # padded hidden size (full lane width)
LANE = 128
NEG_BIG = -1.0e30    # bias value for padded action columns (exp -> exactly 0)


def _round_up(x, m):
    return ((x + m - 1) // m) * m


def actor_kernel(x_ref, w1_ref, b1_ref, w2_ref, b2_ref, w3_ref, b3_ref,
                 out_ref, *, action_dim):
    # x block: (TB, state_dim) f32
    x = x_ref[...]

    # fc1 + relu  (bf16 matmul, f32 accumulate / bias / relu)
    h1 = jnp.dot(x.astype(jnp.bfloat16), w1_ref[...],
                 preferred_element_type=jnp.float32) + b1_ref[...]
    h1 = jnp.maximum(h1, 0.0)                       # (TB, 128)

    # fc2 + relu
    h2 = jnp.dot(h1.astype(jnp.bfloat16), w2_ref[...],
                 preferred_element_type=jnp.float32) + b2_ref[...]
    h2 = jnp.maximum(h2, 0.0)                       # (TB, 128)

    # fc3: padded action columns get -1e30 from the bias (weights there are 0),
    # so no explicit mask is needed before the softmax.
    logits = jnp.dot(h2.astype(jnp.bfloat16), w3_ref[...],
                     preferred_element_type=jnp.float32) + b3_ref[...]

    # Numerically stable softmax over the last (lane) dim; exact division.
    m = jnp.max(logits, axis=-1, keepdims=True)
    e = jnp.exp(logits - m)                          # padded cols -> exactly 0
    denom = jnp.sum(e, axis=-1, keepdims=True)
    probs = e / denom                                # (TB, A_pad)

    # Store only the real action columns (lane-masked store, but the HBM
    # writeback bytes are the dominant traffic term — keep them minimal).
    out_ref[...] = probs[:, :action_dim].astype(out_ref.dtype)


def actor_forward(state, params, *, tile_b=1024):
    """state: (B, state_dim) float32. params: dict of w1,b1,w2,b2,w3,b3 (unpadded)."""
    w1, b1 = params["w1"], params["b1"]
    w2, b2 = params["w2"], params["b2"]
    w3, b3 = params["w3"], params["b3"]

    B, state_dim = state.shape
    action_dim = w3.shape[1]
    a_pad = _round_up(action_dim, LANE)

    # ---- weight / bias prep: zero-pad hidden->128, action->128; bf16 weights.
    def pad2(x, rows, cols, fill=0.0):
        return jnp.pad(x, ((0, rows - x.shape[0]), (0, cols - x.shape[1])),
                       constant_values=fill)

    w1p = pad2(w1, state_dim, HIDDEN_PAD).astype(jnp.bfloat16)   # (S, 128)
    b1p = pad2(b1, 1, HIDDEN_PAD)                                # (1, 128) f32
    w2p = pad2(w2, HIDDEN_PAD, HIDDEN_PAD).astype(jnp.bfloat16)  # (128, 128)
    b2p = pad2(b2, 1, HIDDEN_PAD)                                # (1, 128) f32
    w3p = pad2(w3, HIDDEN_PAD, a_pad).astype(jnp.bfloat16)       # (128, A_pad)
    # Padded action columns: bias = -1e30 so exp() underflows to exactly 0.
    b3p = pad2(b3, 1, a_pad, fill=NEG_BIG)                       # (1, A_pad) f32

    # ---- batch tiling: large tiles (amortize per-step overhead), but cap so the
    # grid has >= ~4 steps when the batch is big enough (v7x dual-TC sharding).
    tb = min(_round_up(tile_b, 8), _round_up(pl.cdiv(B, 4), 8))
    tb = max(tb, 8)
    grid = (pl.cdiv(B, tb),)    # partial trailing block handled by Pallas; no jnp.pad

    const = lambda i: (0, 0)    # weights / biases: resident in VMEM

    out = pl.pallas_call(
        functools.partial(actor_kernel, action_dim=action_dim),
        out_shape=jax.ShapeDtypeStruct((B, action_dim), jnp.float32),
        grid=grid,
        in_specs=[
            pl.BlockSpec((tb, state_dim), lambda i: (i, 0)),
            pl.BlockSpec((state_dim, HIDDEN_PAD), const),
            pl.BlockSpec((1, HIDDEN_PAD), const),
            pl.BlockSpec((HIDDEN_PAD, HIDDEN_PAD), const),
            pl.BlockSpec((1, HIDDEN_PAD), const),
            pl.BlockSpec((HIDDEN_PAD, a_pad), const),
            pl.BlockSpec((1, a_pad), const),
        ],
        out_specs=pl.BlockSpec((tb, action_dim), lambda i: (i, 0)),
        compiler_params=pltpu.CompilerParams(
            dimension_semantics=("parallel",)),
    )(state, w1p, b1p, w2p, b2p, w3p, b3p)

    return out


def init_params(key, state_dim, action_dim, hidden=HIDDEN):
    """Deterministic synthetic parameters (shapes match nn.Linear in Actor)."""
    ks = jax.random.split(key, 6)

    def lin(kw, kb, fan_in, fan_out):
        bound = 1.0 / jnp.sqrt(fan_in)
        w = jax.random.uniform(kw, (fan_in, fan_out), jnp.float32, -bound, bound)
        b = jax.random.uniform(kb, (1, fan_out), jnp.float32, -bound, bound)
        return w, b

    w1, b1 = lin(ks[0], ks[1], state_dim, hidden)
    w2, b2 = lin(ks[2], ks[3], hidden, hidden)
    w3, b3 = lin(ks[4], ks[5], hidden, action_dim)
    return {"w1": w1, "b1": b1, "w2": w2, "b2": b2, "w3": w3, "b3": b3}


def actor_reference(state, params):
    """Pure-JAX f32 reference for correctness checks."""
    h1 = jnp.maximum(state @ params["w1"] + params["b1"], 0.0)
    h2 = jnp.maximum(h1 @ params["w2"] + params["b2"], 0.0)
    logits = h2 @ params["w3"] + params["b3"]
    return jax.nn.softmax(logits, axis=-1)


if __name__ == "__main__":
    key = jax.random.PRNGKey(0)
    k_params, k_state = jax.random.split(key)

    batch = 8
    state_dim = 32
    action_dim = 8

    params = init_params(k_params, state_dim, action_dim)
    state = jax.random.normal(k_state, (batch, state_dim), jnp.float32)

    weights = actor_forward(state, params)
    jax.block_until_ready(weights)

    assert weights.shape == (batch, action_dim)

    # Rows sum to ~1 (exact division -> f32 rounding only).
    row_sums = jnp.sum(weights, axis=-1)
    assert bool(jnp.all(jnp.abs(row_sums - 1.0) < 1e-4)), row_sums

    # Matches the f32 reference within bf16-matmul tolerance.
    ref = actor_reference(state, params)
    assert bool(jnp.all(jnp.abs(weights - ref) < 2e-2))

    print("KERNEL_OK")
</pallas_src>

<mosaic_0001>
module attributes {stable_mosaic.version = 11 : i64} {
  func.func @actor_kernel(%arg0: i32, %arg1: memref<8x32xf32, #tpu.memory_space<vmem>>, %arg2: memref<32x128xbf16, #tpu.memory_space<vmem>>, %arg3: memref<1x128xf32, #tpu.memory_space<vmem>>, %arg4: memref<128x128xbf16, #tpu.memory_space<vmem>>, %arg5: memref<1x128xf32, #tpu.memory_space<vmem>>, %arg6: memref<128x128xbf16, #tpu.memory_space<vmem>>, %arg7: memref<1x128xf32, #tpu.memory_space<vmem>>, %arg8: memref<8x8xf32, #tpu.memory_space<vmem>>) attributes {dimension_semantics = [#tpu.dimension_semantics<parallel>], iteration_bounds = array<i64: 1>, scalar_prefetch = 0 : i64, scratch_operands = 0 : i64, tpu.core_type = #tpu.core_type<tc>, window_params = [{transform_indices = @transform_0, window_bounds = array<i64: 8, 32>}, {pipeline_mode = #tpu.pipeline_mode<synchronous>, transform_indices = @transform_1, window_bounds = array<i64: 32, 128>}, {pipeline_mode = #tpu.pipeline_mode<synchronous>, transform_indices = @transform_2, window_bounds = array<i64: 1, 128>}, {pipeline_mode = #tpu.pipeline_mode<synchronous>, transform_indices = @transform_3, window_bounds = array<i64: 128, 128>}, {pipeline_mode = #tpu.pipeline_mode<synchronous>, transform_indices = @transform_4, window_bounds = array<i64: 1, 128>}, {pipeline_mode = #tpu.pipeline_mode<synchronous>, transform_indices = @transform_5, window_bounds = array<i64: 128, 128>}, {pipeline_mode = #tpu.pipeline_mode<synchronous>, transform_indices = @transform_6, window_bounds = array<i64: 1, 128>}, {transform_indices = @transform_7, window_bounds = array<i64: 8, 8>}]} {
    %c0 = arith.constant 0 : index
    %c0_0 = arith.constant 0 : index
    %0 = vector.load %arg1[%c0, %c0_0] : memref<8x32xf32, #tpu.memory_space<vmem>>, vector<8x32xf32>
    %1 = arith.truncf %0 : vector<8x32xf32> to vector<8x32xbf16>
    %c0_1 = arith.constant 0 : index
    %c0_2 = arith.constant 0 : index
    %2 = vector.load %arg2[%c0_1, %c0_2] : memref<32x128xbf16, #tpu.memory_space<vmem>>, vector<32x128xbf16>
    %cst = arith.constant dense<0.000000e+00> : vector<8x128xf32>
    %3 = tpu.matmul %1, %2, %cst {dimension_numbers = #tpu.dot_dimension_numbers<[1], [0], [0], [1], [0, 0, 1, 1], [], []>} : vector<8x32xbf16>, vector<32x128xbf16>, vector<8x128xf32> -> vector<8x128xf32>
    %c0_3 = arith.constant 0 : index
    %c0_4 = arith.constant 0 : index
    %4 = vector.load %arg3[%c0_3, %c0_4] : memref<1x128xf32, #tpu.memory_space<vmem>>, vector<1x128xf32>
    %5 = vector.broadcast %4 : vector<1x128xf32> to vector<8x128xf32>
    %6 = arith.addf %3, %5 : vector<8x128xf32>
    %cst_5 = arith.constant 0.000000e+00 : f32
    %7 = vector.broadcast %cst_5 : f32 to vector<8x128xf32>
    %8 = arith.maximumf %6, %7 : vector<8x128xf32>
    %9 = arith.truncf %8 : vector<8x128xf32> to vector<8x128xbf16>
    %c0_6 = arith.constant 0 : index
    %c0_7 = arith.constant 0 : index
    %10 = vector.load %arg4[%c0_6, %c0_7] : memref<128x128xbf16, #tpu.memory_space<vmem>>, vector<128x128xbf16>
    %cst_8 = arith.constant dense<0.000000e+00> : vector<8x128xf32>
    %11 = tpu.matmul %9, %10, %cst_8 {dimension_numbers = #tpu.dot_dimension_numbers<[1], [0], [0], [1], [0, 0, 1, 1], [], []>} : vector<8x128xbf16>, vector<128x128xbf16>, vector<8x128xf32> -> vector<8x128xf32>
    %c0_9 = arith.constant 0 : index
    %c0_10 = arith.constant 0 : index
    %12 = vector.load %arg5[%c0_9, %c0_10] : memref<1x128xf32, #tpu.memory_space<vmem>>, vector<1x128xf32>
    %13 = vector.broadcast %12 : vector<1x128xf32> to vector<8x128xf32>
    %14 = arith.addf %11, %13 : vector<8x128xf32>
    %cst_11 = arith.constant 0.000000e+00 : f32
    %15 = vector.broadcast %cst_11 : f32 to vector<8x128xf32>
    %16 = arith.maximumf %14, %15 : vector<8x128xf32>
    %17 = arith.truncf %16 : vector<8x128xf32> to vector<8x128xbf16>
    %c0_12 = arith.constant 0 : index
    %c0_13 = arith.constant 0 : index
    %18 = vector.load %arg6[%c0_12, %c0_13] : memref<128x128xbf16, #tpu.memory_space<vmem>>, vector<128x128xbf16>
    %cst_14 = arith.constant dense<0.000000e+00> : vector<8x128xf32>
    %19 = tpu.matmul %17, %18, %cst_14 {dimension_numbers = #tpu.dot_dimension_numbers<[1], [0], [0], [1], [0, 0, 1, 1], [], []>} : vector<8x128xbf16>, vector<128x128xbf16>, vector<8x128xf32> -> vector<8x128xf32>
    %c0_15 = arith.constant 0 : index
    %c0_16 = arith.constant 0 : index
    %20 = vector.load %arg7[%c0_15, %c0_16] : memref<1x128xf32, #tpu.memory_space<vmem>>, vector<1x128xf32>
    %21 = vector.broadcast %20 : vector<1x128xf32> to vector<8x128xf32>
    %22 = arith.addf %19, %21 : vector<8x128xf32>
    %cst_17 = arith.constant dense<0xFF800000> : vector<8xf32>
    %23 = vector.multi_reduction <maximumf>, %22, %cst_17 [1] : vector<8x128xf32> to vector<8xf32>
    %24 = vector.shape_cast %23 : vector<8xf32> to vector<8x1xf32>
    %25 = vector.broadcast %24 : vector<8x1xf32> to vector<8x128xf32>
    %26 = arith.subf %22, %25 : vector<8x128xf32>
    %27 = math.exp %26 : vector<8x128xf32>
    %cst_18 = arith.constant dense<0.000000e+00> : vector<8xf32>
    %28 = vector.multi_reduction <add>, %27, %cst_18 [1] : vector<8x128xf32> to vector<8xf32>
    %29 = vector.shape_cast %28 : vector<8xf32> to vector<8x1xf32>
    %30 = vector.broadcast %29 : vector<8x1xf32> to vector<8x128xf32>
    %31 = arith.divf %27, %30 : vector<8x128xf32>
    %32 = vector.extract_strided_slice %31 {offsets = [0, 0], sizes = [8, 8], strides = [1, 1]} : vector<8x128xf32> to vector<8x8xf32>
    %c0_19 = arith.constant 0 : index
    %c0_20 = arith.constant 0 : index
    %33 = vector.load %arg8[%c0_19, %c0_20] : memref<8x8xf32, #tpu.memory_space<vmem>>, vector<8x8xf32>
    tpu.vector_store %arg8[%c0_19, %c0_20], %32 {strides = array<i32>} : memref<8x8xf32, #tpu.memory_space<vmem>>, vector<8x8xf32>,
    return
  }
  func.func @transform_0(%arg0: i32) -> (i32, i32) {
    %c0_i32 = arith.constant 0 : i32
    %c0_i32_0 = arith.constant 0 : i32
    return %arg0, %c0_i32 : i32, i32
  }
  func.func @transform_1(%arg0: i32) -> (i32, i32) {
    %c0_i32 = arith.constant 0 : i32
    %c0_i32_0 = arith.constant 0 : i32
    %c0_i32_1 = arith.constant 0 : i32
    return %c0_i32, %c0_i32_0 : i32, i32
  }
  func.func @transform_2(%arg0: i32) -> (i32, i32) {
    %c0_i32 = arith.constant 0 : i32
    %c0_i32_0 = arith.constant 0 : i32
    %c0_i32_1 = arith.constant 0 : i32
    return %c0_i32, %c0_i32_0 : i32, i32
  }
  func.func @transform_3(%arg0: i32) -> (i32, i32) {
    %c0_i32 = arith.constant 0 : i32
    %c0_i32_0 = arith.constant 0 : i32
    %c0_i32_1 = arith.constant 0 : i32
    return %c0_i32, %c0_i32_0 : i32, i32
  }
  func.func @transform_4(%arg0: i32) -> (i32, i32) {
    %c0_i32 = arith.constant 0 : i32
    %c0_i32_0 = arith.constant 0 : i32
    %c0_i32_1 = arith.constant 0 : i32
    return %c0_i32, %c0_i32_0 : i32, i32
  }
  func.func @transform_5(%arg0: i32) -> (i32, i32) {
    %c0_i32 = arith.constant 0 : i32
    %c0_i32_0 = arith.constant 0 : i32
    %c0_i32_1 = arith.constant 0 : i32
    return %c0_i32, %c0_i32_0 : i32, i32
  }
  func.func @transform_6(%arg0: i32) -> (i32, i32) {
    %c0_i32 = arith.constant 0 : i32
    %c0_i32_0 = arith.constant 0 : i32
    %c0_i32_1 = arith.constant 0 : i32
    return %c0_i32, %c0_i32_0 : i32, i32
  }
  func.func @transform_7(%arg0: i32) -> (i32, i32) {
    %c0_i32 = arith.constant 0 : i32
    %c0_i32_0 = arith.constant 0 : i32
    return %arg0, %c0_i32 : i32, i32
  }
}

</mosaic_0001>

<bundles_post_ra>
// kernel: tpu_custom_call.1
= control target key start
LH: loop header
LB: loop body
LE: loop exit
PB: predicated region body
PF: predicated region fallthrough
CT: control target
= control target key end

     0   :  { %12 = vsyncpa [#allocation3], 0  ;;  %s740_s0 = inlined_call_operand.hbm [shape: f32[8,32], index: 0, kind: input, shape index: {}]   ;;  %s741_s1 = inlined_call_operand.hbm [shape: bf16[32,128], index: 1, kind: input, shape index: {}]   ;;  %s742_s2 = inlined_call_operand.vmem [shape: f32[1,128], index: 2, kind: input, shape index: {}]   ;;  %s743_s3 = inlined_call_operand.hbm [shape: bf16[128,128], index: 3, kind: input, shape index: {}]   ;;  %s744_s4 = inlined_call_operand.vmem [shape: f32[1,128], index: 4, kind: input, shape index: {}]   ;;  %s745_s5 = inlined_call_operand.hbm [shape: bf16[128,128], index: 5, kind: input, shape index: {}]   ;;  %s746_s6 = inlined_call_operand.vmem [shape: f32[1,128], index: 6, kind: input, shape index: {}]   ;;  %s747_s7 = inlined_call_operand.hbm [shape: f32[8,8], index: 7, kind: output, shape index: {}]  }
   0x1   :  { %13 = vsyncpa [#allocation6], 0 }
   0x2   :  { %14 = vsyncpa [#allocation9], 0 }
   0x3   :  { %15 = vsyncpa [#allocation4], 0  ;;  %s634_s24 = smov [#allocation5]  }
   0x4   :  { %s31_s25 = sshll.u32 %s634_s24, 4  ;;  %s32_s25 = int_to_ptr.vmem [resolvable:$true] %s31_s25 }
   0x5   :  { %s534_s26 = scalar_lea.vmem %s32_s25, 256  ;;  %p539_p1 = scmp.lt.s32.totalorder %s32_s25, %s32_s25 }
   0x6   :  { %p535_p0 = scmp.ne.s32.totalorder %s32_s25, %s534_s26  ;;  %p540_p2 = scmp.lt.s32.totalorder %s534_s26, %s534_s26 }
   0x8   :  { %p541_p3 = por %p540_p2, %p539_p1 }
   0xa   :  { %p542_p4 = pnand %p541_p3, %p535_p0 }
   0xc   :  { %545 = shalt.err (!%p542_p4)
}
   0xd   :  { %s635_s27 = smov 64   ;;  %s636_s28 = smov 4  }
   0xe   :  { %37 = dma.hbm_to_vmem [thread:$0]  %s741_s1, 256, %s32_s25, [#allocation6], %s635_s27, %s635_s27, %s636_s28  }
   0xf   :  { %s637_s8 = smov [#allocation2]   ;;  %s638_s10 = smov [#allocation7]  }
  0x10   :  { %s22_s9 = sshll.u32 %s637_s8, 4  ;;  %s45_s11 = sshll.u32 %s638_s10, 4  ;;  %s23_s9 = int_to_ptr.vmem [resolvable:$true] %s22_s9  ;;  %s46_s11 = int_to_ptr.vmem [resolvable:$true] %s45_s11 }
  0x11   :  { %s554_s12 = scalar_lea.vmem %s23_s9, 128  ;;  %p559_p6 = scmp.lt.s32.totalorder %s23_s9, %s23_s9 }
  0x12   :  { %p555_p5 = scmp.ne.s32.totalorder %s23_s9, %s554_s12  ;;  %p560_p7 = scmp.lt.s32.totalorder %s554_s12, %s554_s12 }
  0x14   :  { %p561_p8 = por %p560_p7, %p559_p6 }
  0x16   :  { %p562_p9 = pnand %p561_p8, %p555_p5 }
  0x18   :  { %565 = shalt.err (!%p562_p9)
}
  0x19   :  { %25 = dma.hbm_to_vmem [thread:$0]  %s740_s0, 128, %s23_s9, [#allocation3]  }
  0x1a   :  { %s574_s15 = scalar_lea.vmem %s46_s11, 1024  ;;  %p579_p11 = scmp.lt.s32.totalorder %s46_s11, %s46_s11 }
  0x1b   :  { %p575_p10 = scmp.ne.s32.totalorder %s46_s11, %s574_s15  ;;  %p580_p12 = scmp.lt.s32.totalorder %s574_s15, %s574_s15 }
  0x1d   :  { %p581_p13 = por %p580_p12, %p579_p11 }
  0x1f   :  { %p582_p0 = pnand %p581_p13, %p575_p10 }
  0x21   :  { %585 = shalt.err (!%p582_p0)
}
  0x22   :  { %51 = dma.hbm_to_vmem [thread:$0]  %s743_s3, 1024, %s46_s11, [#allocation6], %s635_s27, %s635_s27, %s636_s28  }
  0x23   :  { %s639_s17 = smov [#allocation8]  }
  0x24   :  { %s59_s18 = sshll.u32 %s639_s17, 4  ;;  %s60_s18 = int_to_ptr.vmem [resolvable:$true] %s59_s18 }
  0x25   :  { %s594_s19 = scalar_lea.vmem %s60_s18, 1024  ;;  %p599_p2 = scmp.lt.s32.totalorder %s60_s18, %s60_s18 }
  0x26   :  { %p595_p1 = scmp.ne.s32.totalorder %s60_s18, %s594_s19  ;;  %p600_p3 = scmp.lt.s32.totalorder %s594_s19, %s594_s19 }
  0x28   :  { %p601_p4 = por %p600_p3, %p599_p2 }
  0x2a   :  { %p602_p5 = pnand %p601_p4, %p595_p1 }
  0x2c   :  { %605 = shalt.err (!%p602_p5)
}
  0x2d   :  { %65 = dma.hbm_to_vmem [thread:$0]  %s745_s5, 1024, %s60_s18, [#allocation9], %s635_s27, %s635_s27, %s636_s28  }
  0x2e   :  { %626 = dma.done.wait [#allocation3], 128  }
  0x2f   :  { %627 = vsyncadd [#allocation3], 4294967168 }
  0x30   :  { %628 = dma.done.wait [#allocation6], 1280  }
  0x31   :  { %629 = vsyncadd [#allocation6], 4294966016 }
  0x32   :  { %630 = dma.done.wait [#allocation9], 1024  }
  0x33   :  { %631 = vsyncadd [#allocation9], 4294966272  ;;  %v640_v0 = vmov 0.0   ;;  %vm641_vm0 = vmmov 0   ;;  %v504_v1 = vld [vmem:[#allocation5 + $0x8] sm:$0xff]   ;;  %v505_v2 = vld [vmem:[#allocation5] sm:$0xff]  }
  0x34   :  { %447 = vmatprep.subr.bf16.mxu0 %v640_v0  ;;  %451 = vmatprep.mubr.msk.bf16.mxu0 %vm641_vm0, %v640_v0  ;;  %v81_v3 = vld [vmem:[#allocation2] sm:$0xff]  ;;  %v506_v4 = vld [vmem:[#allocation7 + $0x38] sm:$0xff]   ;;  %v507_v6 = vld [vmem:[#allocation7 + $0x30] sm:$0xff]   ;;  %vm106_vm1 = vcmask 261120   ;;  %vm385_vm2 = vcmask 64512  }
  0x35   :  { %455 = vmatprep.subr.bf16.mxu1 %v640_v0  ;;  %471 = vmatprep.mubr.msk.bf16.mxu1 %vm641_vm0, %v640_v0  ;;  %v82_v5 = vpack.c.bf16 %v81_v3, %v81_v3  ;;  %v508_v7 = vld [vmem:[#allocation7 + $0x28] sm:$0xff]   ;;  %v509_v8 = vld [vmem:[#allocation7 + $0x20] sm:$0xff]   ;;  %v510_v9 = vld [vmem:[#allocation7 + $0x18] sm:$0xff]  }
  0x36   :  { %448 = vmatpush3.bf16.msra.mxu0 %v504_v1  ;;  %456 = vmatpush3.bf16.msra.mxu1 %v506_v4  ;;  %v511_v10 = vld [vmem:[#allocation7 + $0x10] sm:$0xff]   ;;  %v512_v11 = vld [vmem:[#allocation7 + $0x8] sm:$0xff]   ;;  %v513_v12 = vld [vmem:[#allocation7] sm:$0xff]  }
  0x37   :  { %449 = vmatprep.subr.bf16.mxu0 %v640_v0  ;;  %457 = vmatprep.subr.bf16.mxu1 %v640_v0  ;;  %v514_v13 = vld [vmem:[#allocation8 + $0x38] sm:$0xff]   ;;  %v515_v14 = vld [vmem:[#allocation8 + $0x30] sm:$0xff]   ;;  %v516_v15 = vld [vmem:[#allocation8 + $0x28] sm:$0xff]  }
  0x38   :  { %v517_v16 = vld [vmem:[#allocation8 + $0x20] sm:$0xff]   ;;  %v518_v17 = vld [vmem:[#allocation8 + $0x18] sm:$0xff]   ;;  %v519_v18 = vld [vmem:[#allocation8 + $0x10] sm:$0xff]  }
  0x39   :  { %v404_v19 = vld [vmem:[%s742_s2] ss:$0 sm:$0xff]  ;;  %v521_v28 = vld [vmem:[#allocation8] sm:$0xff]  }
  0x3a   :  { %450 = vmatpush3.bf16.msra.mxu0 %v505_v2  ;;  %458 = vmatpush3.bf16.msra.mxu1 %v507_v6  ;;  %v520_v27 = vld [vmem:[#allocation8 + $0x8] sm:$0xff]  }
  0x3b   :  { %475 = vmatprep.subr.bf16.mxu0 %v640_v0  ;;  %459 = vmatprep.subr.bf16.mxu1 %v640_v0  ;;  %v408_v29 = vld [vmem:[%s744_s4] ss:$0 sm:$0xff]  ;;  %s642_s4 = smov [#allocation10]  }
  0x3c   :  { %v417_v37 = vld [vmem:[%s746_s6] ss:$0 sm:$0xff]  ;;  %s393_s24 = sshll.u32 %s642_s4, 4  ;;  %s394_s24 = int_to_ptr.vmem [resolvable:$true] %s393_s24 }
  0x3d   :  { %452 = vmatmul.mubr.msk.bf16.vlgmr.msra.gmra.mxu0 %vm106_vm1, %v82_v5  ;;  %s606_s6 = scalar_lea.vmem %s394_s24, 128  ;;  %p611_p7 = scmp.lt.s32.totalorder %s394_s24, %s394_s24 }
  0x3e   :  { %491 = vmatprep.mubr.msk.bf16.mxu0 %vm641_vm0, %v640_v0  ;;  %460 = vmatpush3.bf16.msra.mxu1 %v508_v7  ;;  %p607_p6 = scmp.ne.s32.totalorder %s394_s24, %s606_s6  ;;  %p612_p8 = scmp.lt.s32.totalorder %s606_s6, %s606_s6 }
  0x3f   :  { %461 = vmatprep.subr.bf16.mxu1 %v640_v0  ;;  %476 = vmatpush3.bf16.msra.mxu0 %v514_v13 }
  0x40   :  { %477 = vmatprep.subr.bf16.mxu0 %v640_v0  ;;  %p613_p9 = por %p612_p8, %p611_p7 }
  0x42   :  { %462 = vmatpush3.bf16.msra.mxu1 %v509_v8  ;;  %p614_p10 = pnand %p613_p9, %p607_p6 }
  0x43   :  { %463 = vmatprep.subr.bf16.mxu1 %v640_v0  ;;  %478 = vmatpush3.bf16.msra.mxu0 %v515_v14 }
  0x44   :  { %479 = vmatprep.subr.bf16.mxu0 %v640_v0 }
  0x46   :  { %464 = vmatpush3.bf16.msra.mxu1 %v510_v9 }
  0x47   :  { %465 = vmatprep.subr.bf16.mxu1 %v640_v0  ;;  %480 = vmatpush3.bf16.msra.mxu0 %v516_v15 }
  0x48   :  { %481 = vmatprep.subr.bf16.mxu0 %v640_v0 }
  0x4a   :  { %466 = vmatpush3.bf16.msra.mxu1 %v511_v10 }
  0x4b   :  { %467 = vmatprep.subr.bf16.mxu1 %v640_v0  ;;  %482 = vmatpush3.bf16.msra.mxu0 %v517_v16 }
  0x4c   :  { %483 = vmatprep.subr.bf16.mxu0 %v640_v0 }
  0x4e   :  { %468 = vmatpush3.bf16.msra.mxu1 %v512_v11 }
  0x4f   :  { %469 = vmatprep.subr.bf16.mxu1 %v640_v0  ;;  %484 = vmatpush3.bf16.msra.mxu0 %v518_v17 }
  0x50   :  { %485 = vmatprep.subr.bf16.mxu0 %v640_v0 }
  0x52   :  { %470 = vmatpush3.bf16.msra.mxu1 %v513_v12 }
  0x53   :  { %486 = vmatpush3.bf16.msra.mxu0 %v519_v18 }
  0x54   :  { %487 = vmatprep.subr.bf16.mxu0 %v640_v0 }
  0x57   :  { %488 = vmatpush3.bf16.msra.mxu0 %v520_v27 }
  0x58   :  { %489 = vmatprep.subr.bf16.mxu0 %v640_v0 }
  0x5b   :  { %490 = vmatpush3.bf16.msra.mxu0 %v521_v28 }
  0xfd   :  { %v144_v20 = vpop.f32.mrf.mxu0 }
  0xfe   :  { %v145_v21 = vadd.f32 %v404_v19, %v144_v20 }
  0xff   :  { %v453_v22 = vpop.f32.mrf.mxu0 }
 0x100   :  { %v150_v23 = vmax.f32 %v145_v21, 0.0 }
 0x101   :  { %v147_v24 = vpop.f32.mrf.mxu0 }
 0x102   :  { %v151_v25 = vpack.c.bf16 %v150_v23, %v150_v23 }
 0x103   :  { %v454_v26 = vpop.f32.mrf.mxu0 }
 0x104   :  { %472 = vmatmul.mubr.bf16.vlgmr.msra.gmra.mxu1 %v151_v25 }
 0x1c4   :  { %v257_v30 = vpop.f32.mrf.mxu1 }
 0x1c5   :  { %v258_v31 = vadd.f32 %v408_v29, %v257_v30 }
 0x1c6   :  { %v473_v32 = vpop.f32.mrf.mxu1 }
 0x1c7   :  { %v263_v33 = vmax.f32 %v258_v31, 0.0 }
 0x1c8   :  { %v260_v34 = vpop.f32.mrf.mxu1 }
 0x1c9   :  { %v264_v35 = vpack.c.bf16 %v263_v33, %v263_v33 }
 0x1ca   :  { %v474_v36 = vpop.f32.mrf.mxu1 }
 0x1cb   :  { %492 = vmatmul.mubr.bf16.vlgmr.msra.gmra.mxu0 %v264_v35 }
 0x28b   :  { %v370_v38 = vpop.f32.mrf.mxu0 }
 0x28c   :  { %v371_v39 = vadd.f32 %v417_v37, %v370_v38 }
 0x28d   :  { %v493_v40 = vpop.f32.mrf.mxu0 }
 0x28e   :  { %376 = vmax.xlane.f32.xlu0 %v371_v39 }
 0x28f   :  { %v373_v41 = vpop.f32.mrf.mxu0 }
 0x291   :  { %v494_v42 = vpop.f32.mrf.mxu0 }
 0x317   :  { %v377_v43 = vpop.xlane.xlu0 %376 }
 0x318   :  { %v378_v44 = vsub.f32 %v371_v39, %v377_v43 }
 0x31a   :  { %v379_v45 = vmul.f32 1.442695, %v378_v44 }
 0x31c   :  { %522 = vpow2.f32 %v379_v45 }
 0x329   :  { %v523_v46 = vpop.eup %522 }
 0x32a   :  { %381 = vadd.xlane.f32.xlu0 %v523_v46 }
 0x3b3   :  { %v382_v47 = vpop.xlane.xlu0 %381 }
 0x3b4   :  { %524 = vrcp.f32 %v382_v47 }
 0x3c1   :  { %v525_v48 = vpop.eup %524 }
 0x3c2   :  { %v384_v49 = vmul.f32 %v525_v48, %v523_v46 }
 0x3c4   :  { %386 = vst.msk [vmem:[#allocation10] sm:$0xff] %vm385_vm2, %v384_v49 }
 0x3c5   :  { %617 = shalt.err (!%p614_p10)
}
 0x3c6   :  { %396 = dma.vmem_to_hbm [thread:$0]  %s394_s24, 128, %s747_s7, [#allocation4]  }
 0x3c7   :  { %632 = dma.done.wait [#allocation4], 128  }
 0x3c8   :  { %633 = vsyncadd [#allocation4], 4294967168 }
 0x3c9   :  { %400 = vsyncpa [#allocation3], 1 }
 0x3ca   :  { %401 = vsyncpa [#allocation6], 1 }
 0x3cb   :  { %402 = vsyncpa [#allocation9], 1 }
 0x3cc   :  { %403 = vsyncpa [#allocation4], 1 }

</bundles_post_ra>
